<compile_context>
chip_gen: v7x
topology: tpu7x:2x2x1
jax: 0.10.0
libtpu: 0.0.40
codegen_flags: <defaults>
</compile_context>

<pallas_src>
import functools

import jax
import jax.numpy as jnp
from jax.experimental import pallas as pl
from jax.experimental.pallas import tpu as pltpu


# ---------------------------------------------------------------------------
# Fused kernel: conv1+BN+ReLU (activation stays in VMEM) -> conv2+BN+ReLU
# ---------------------------------------------------------------------------
def _double_conv_kernel(x_ref, w1_ref, sb1_ref, w2_ref, sb2_ref, o_ref,
                        xrows_ref, yrows_ref, *, H, W, C1, C2, C3):
    # x_ref   : (1, H, W*C1)        bf16  lane-dense input tile (one batch elem)
    # w1_ref  : (3, W*C1, W*C2)     bf16  banded conv1 weights (one band per kh)
    # w2_ref  : (3, W*C2, W*C3)     bf16  banded conv2 weights
    # sb1/sb2 : (2, W*Cout)         f32   row 0 = tiled BN scale, row 1 = bias
    # o_ref   : (1, H, W*C3)        f32   lane-dense output
    # xrows_ref: VMEM (H+2, W*C1)   bf16  H-halo'd input rows
    # yrows_ref: VMEM (H+2, W*C2)   bf16  H-halo'd conv1 activation rows

    # Zero ONLY the two H-halo rows of each scratch (width halo lives in the
    # banded weights).  Done every step: 4 single-row stores, essentially free,
    # and correct regardless of how a core-parallel batch axis is scheduled.
    zx = jnp.zeros((1, W * C1), jnp.bfloat16)
    zy = jnp.zeros((1, W * C2), jnp.bfloat16)
    xrows_ref[pl.ds(0, 1), :] = zx
    xrows_ref[pl.ds(H + 1, 1), :] = zx
    yrows_ref[pl.ds(0, 1), :] = zy
    yrows_ref[pl.ds(H + 1, 1), :] = zy

    def conv_bn_relu(rows_ref, w_ref, sb_ref, out_lanes):
        acc = jnp.zeros((H, out_lanes), jnp.float32)
        for kh in range(3):                                   # static, unrolled
            acc = acc + jnp.dot(rows_ref[pl.ds(kh, H), :], w_ref[kh],
                                preferred_element_type=jnp.float32)
        sb = sb_ref[...]                                      # (2, out_lanes) f32
        y = acc * sb[0:1, :] + sb[1:2, :]                     # BN (eval), f32
        return jnp.maximum(y, 0.0)                            # ReLU, f32

    # --- stage 1: conv1 + BN + ReLU, activation kept in VMEM ----------------
    xrows_ref[pl.ds(1, H), :] = x_ref[0]                      # already bf16
    y1 = conv_bn_relu(xrows_ref, w1_ref, sb1_ref, W * C2)
    yrows_ref[pl.ds(1, H), :] = y1.astype(jnp.bfloat16)

    # --- stage 2: conv2 + BN + ReLU, lane-dense store ------------------------
    y2 = conv_bn_relu(yrows_ref, w2_ref, sb2_ref, W * C3)
    o_ref[0] = y2.astype(o_ref.dtype)


# ---------------------------------------------------------------------------
# Banded lane-dense weights: fold kw taps + SAME width padding into a matrix.
#   band[kh][u*Cin + ci, w*Cout + co] = W[kh, kw, ci, co] iff u == w + kw - 1
# ---------------------------------------------------------------------------
def _band_weights(w_hwio, wd):
    _, _, cin, cout = w_hwio.shape
    u = jnp.arange(wd)[:, None, None]
    wc = jnp.arange(wd)[None, :, None]
    kw = jnp.arange(3)[None, None, :]
    sel = (u == wc + kw - 1).astype(w_hwio.dtype)             # (wd, wd, 3)
    band = jnp.einsum("uwk,hkio->huiwo", sel, w_hwio)         # (3, wd, cin, wd, cout)
    return band.reshape(3, wd * cin, wd * cout).astype(jnp.bfloat16)


# ---------------------------------------------------------------------------
# DoubleConv.forward (eval-mode BN folded into scale/bias), PyTorch NCHW I/O
# ---------------------------------------------------------------------------
def double_conv_forward(x_nchw, w1, scale1, bias1, w2, scale2, bias2):
    # x_nchw: (N, C1, H, W); w*: HWIO (3, 3, Cin, Cout); scale*/bias*: (Cout,)
    n, c1, h, wd = x_nchw.shape
    c2 = w1.shape[-1]
    c3 = w2.shape[-1]

    # NCHW -> lane-dense (N, H, W*C1) bf16 in one fused XLA pass (halves the
    # input DMA bytes into the kernel).
    x = jnp.transpose(x_nchw, (0, 2, 3, 1)).reshape(n, h, wd * c1)
    x = x.astype(jnp.bfloat16)

    w1b = _band_weights(w1, wd)                                # (3, wd*c1, wd*c2)
    w2b = _band_weights(w2, wd)                                # (3, wd*c2, wd*c3)
    # BN scale/bias pre-tiled to lane-dense width (no broadcasts in kernel).
    sb1 = jnp.stack([jnp.tile(scale1, wd), jnp.tile(bias1, wd)]).astype(jnp.float32)
    sb2 = jnp.stack([jnp.tile(scale2, wd), jnp.tile(bias2, wd)]).astype(jnp.float32)

    # Explicit VMEM budget: blocks (double buffered) + weights + scratches.
    vmem_bytes = (
        2 * (h * wd * c1) * 2            # input blocks, bf16
        + 2 * (h * wd * c3) * 4          # output blocks, f32
        + 2 * 3 * (wd * c1) * (wd * c2) * 2
        + 2 * 3 * (wd * c2) * (wd * c3) * 2
        + 2 * 2 * (wd * c2 + wd * c3) * 4
        + (h + 2) * wd * c1 * 2          # xrows scratch
        + (h + 2) * wd * c2 * 2          # yrows scratch
    )
    vmem_limit = int(min(100 * 1024 * 1024, max(8 * 1024 * 1024, 2 * vmem_bytes)))

    kern = functools.partial(_double_conv_kernel,
                             H=h, W=wd, C1=c1, C2=c2, C3=c3)
    out = pl.pallas_call(
        kern,
        out_shape=jax.ShapeDtypeStruct((n, h, wd * c3), jnp.float32),
        grid=(n,),
        in_specs=[
            pl.BlockSpec((1, h, wd * c1), lambda i: (i, 0, 0)),
            pl.BlockSpec((3, wd * c1, wd * c2), lambda i: (0, 0, 0)),
            pl.BlockSpec((2, wd * c2), lambda i: (0, 0)),
            pl.BlockSpec((3, wd * c2, wd * c3), lambda i: (0, 0, 0)),
            pl.BlockSpec((2, wd * c3), lambda i: (0, 0)),
        ],
        out_specs=pl.BlockSpec((1, h, wd * c3), lambda i: (i, 0, 0)),
        scratch_shapes=[
            pltpu.VMEM((h + 2, wd * c1), jnp.bfloat16),
            pltpu.VMEM((h + 2, wd * c2), jnp.bfloat16),
        ],
        compiler_params=pltpu.CompilerParams(
            dimension_semantics=("parallel",),
            vmem_limit_bytes=vmem_limit),
    )(x, w1b, sb1, w2b, sb2)

    out = out.reshape(n, h, wd, c3)                            # contiguous, free
    return jnp.transpose(out, (0, 3, 1, 2))                    # lane-dense -> NCHW


# ---------------------------------------------------------------------------
# Pure-JAX reference with the SAME numeric contract as the kernel
# (bf16 matmul operands, f32 accumulation, f32 BN/ReLU epilogue).
# ---------------------------------------------------------------------------
def double_conv_reference(x_nchw, w1, s1, b1, w2, s2, b2):
    x = jnp.transpose(x_nchw, (0, 2, 3, 1))

    def cbr(x, wk, s, b):
        y = jax.lax.conv_general_dilated(
            x.astype(jnp.bfloat16), wk.astype(jnp.bfloat16), (1, 1), "SAME",
            dimension_numbers=("NHWC", "HWIO", "NHWC"),
            preferred_element_type=jnp.float32)
        return jnp.maximum(y * s + b, 0.0)

    x = cbr(x, w1, s1, b1)
    x = cbr(x, w2, s2, b2)
    return jnp.transpose(x, (0, 3, 1, 2))


if __name__ == "__main__":
    key = jax.random.PRNGKey(0)
    ks = jax.random.split(key, 11)

    # DoubleConv(in_channels=4, out_channels=8); PyTorch-style NCHW input.
    N, Cin, H, W = 2, 4, 16, 16
    Cmid = Cout = 8

    x = jax.random.normal(ks[0], (N, Cin, H, W), jnp.float32)

    # Conv weights in HWIO layout (= PyTorch OIHW transposed), deterministic.
    w1 = 0.2 * jax.random.normal(ks[1], (3, 3, Cin, Cmid), jnp.float32)
    w2 = 0.2 * jax.random.normal(ks[2], (3, 3, Cmid, Cout), jnp.float32)

    # BatchNorm parameters (eval mode), folded into scale / bias.
    eps = 1e-5
    g1 = 1.0 + 0.1 * jax.random.normal(ks[3], (Cmid,), jnp.float32)
    be1 = 0.1 * jax.random.normal(ks[4], (Cmid,), jnp.float32)
    m1 = 0.1 * jax.random.normal(ks[5], (Cmid,), jnp.float32)
    v1 = 0.5 + jnp.abs(jax.random.normal(ks[6], (Cmid,), jnp.float32))
    g2 = 1.0 + 0.1 * jax.random.normal(ks[7], (Cout,), jnp.float32)
    be2 = 0.1 * jax.random.normal(ks[8], (Cout,), jnp.float32)
    m2 = 0.1 * jax.random.normal(ks[9], (Cout,), jnp.float32)
    v2 = 0.5 + jnp.abs(jax.random.normal(ks[10], (Cout,), jnp.float32))

    s1 = g1 / jnp.sqrt(v1 + eps)
    b1 = be1 - m1 * s1
    s2 = g2 / jnp.sqrt(v2 + eps)
    b2 = be2 - m2 * s2

    out = jax.block_until_ready(double_conv_forward(x, w1, s1, b1, w2, s2, b2))
    ref = jax.block_until_ready(double_conv_reference(x, w1, s1, b1, w2, s2, b2))

    assert out.shape == (N, Cout, H, W), out.shape
    max_err = float(jnp.max(jnp.abs(out - ref)))
    assert jnp.allclose(out, ref, rtol=2e-2, atol=2e-2), max_err

    print("KERNEL_OK")
</pallas_src>

<mosaic_0001>
module attributes {stable_mosaic.version = 11 : i64} {
  func.func @_double_conv_kernel(%arg0: i32, %arg1: memref<1x16x64xbf16, #tpu.memory_space<vmem>>, %arg2: memref<3x64x128xbf16, #tpu.memory_space<vmem>>, %arg3: memref<2x128xf32, #tpu.memory_space<vmem>>, %arg4: memref<3x128x128xbf16, #tpu.memory_space<vmem>>, %arg5: memref<2x128xf32, #tpu.memory_space<vmem>>, %arg6: memref<1x16x128xf32, #tpu.memory_space<vmem>>, %arg7: memref<18x64xbf16, #tpu.memory_space<vmem>>, %arg8: memref<18x128xbf16, #tpu.memory_space<vmem>>) attributes {dimension_semantics = [#tpu.dimension_semantics<parallel>], iteration_bounds = array<i64: 2>, scalar_prefetch = 0 : i64, scratch_operands = 2 : i64, tpu.core_type = #tpu.core_type<tc>, window_params = [{transform_indices = @transform_0, window_bounds = array<i64: 1, 16, 64>}, {pipeline_mode = #tpu.pipeline_mode<synchronous>, transform_indices = @transform_1, window_bounds = array<i64: 3, 64, 128>}, {pipeline_mode = #tpu.pipeline_mode<synchronous>, transform_indices = @transform_2, window_bounds = array<i64: 2, 128>}, {pipeline_mode = #tpu.pipeline_mode<synchronous>, transform_indices = @transform_3, window_bounds = array<i64: 3, 128, 128>}, {pipeline_mode = #tpu.pipeline_mode<synchronous>, transform_indices = @transform_4, window_bounds = array<i64: 2, 128>}, {transform_indices = @transform_5, window_bounds = array<i64: 1, 16, 128>}]} {
    %cst = arith.constant 0.000000e+00 : bf16
    %0 = vector.broadcast %cst : bf16 to vector<1x64xbf16>
    %cst_0 = arith.constant 0.000000e+00 : bf16
    %1 = vector.broadcast %cst_0 : bf16 to vector<1x128xbf16>
    %c0 = arith.constant 0 : index
    %c0_1 = arith.constant 0 : index
    %2 = vector.load %arg7[%c0, %c0_1] : memref<18x64xbf16, #tpu.memory_space<vmem>>, vector<1x64xbf16>
    tpu.vector_store %arg7[%c0, %c0_1], %0 {strides = array<i32>} : memref<18x64xbf16, #tpu.memory_space<vmem>>, vector<1x64xbf16>,
    %c17 = arith.constant 17 : index
    %c0_2 = arith.constant 0 : index
    %3 = vector.load %arg7[%c17, %c0_2] : memref<18x64xbf16, #tpu.memory_space<vmem>>, vector<1x64xbf16>
    tpu.vector_store %arg7[%c17, %c0_2], %0 {strides = array<i32>} : memref<18x64xbf16, #tpu.memory_space<vmem>>, vector<1x64xbf16>,
    %c0_3 = arith.constant 0 : index
    %c0_4 = arith.constant 0 : index
    %4 = vector.load %arg8[%c0_3, %c0_4] : memref<18x128xbf16, #tpu.memory_space<vmem>>, vector<1x128xbf16>
    tpu.vector_store %arg8[%c0_3, %c0_4], %1 {strides = array<i32>} : memref<18x128xbf16, #tpu.memory_space<vmem>>, vector<1x128xbf16>,
    %c17_5 = arith.constant 17 : index
    %c0_6 = arith.constant 0 : index
    %5 = vector.load %arg8[%c17_5, %c0_6] : memref<18x128xbf16, #tpu.memory_space<vmem>>, vector<1x128xbf16>
    tpu.vector_store %arg8[%c17_5, %c0_6], %1 {strides = array<i32>} : memref<18x128xbf16, #tpu.memory_space<vmem>>, vector<1x128xbf16>,
    %c0_7 = arith.constant 0 : index
    %c0_8 = arith.constant 0 : index
    %c0_9 = arith.constant 0 : index
    %6 = vector.load %arg1[%c0_7, %c0_8, %c0_9] : memref<1x16x64xbf16, #tpu.memory_space<vmem>>, vector<1x16x64xbf16>
    %7 = vector.shape_cast %6 : vector<1x16x64xbf16> to vector<16x64xbf16>
    %c1 = arith.constant 1 : index
    %c0_10 = arith.constant 0 : index
    %8 = vector.load %arg7[%c1, %c0_10] : memref<18x64xbf16, #tpu.memory_space<vmem>>, vector<16x64xbf16>
    tpu.vector_store %arg7[%c1, %c0_10], %7 {strides = array<i32>} : memref<18x64xbf16, #tpu.memory_space<vmem>>, vector<16x64xbf16>,
    %cst_11 = arith.constant 0.000000e+00 : f32
    %9 = vector.broadcast %cst_11 : f32 to vector<16x128xf32>
    %c0_12 = arith.constant 0 : index
    %c0_13 = arith.constant 0 : index
    %10 = vector.load %arg7[%c0_12, %c0_13] : memref<18x64xbf16, #tpu.memory_space<vmem>>, vector<16x64xbf16>
    %c0_14 = arith.constant 0 : index
    %c0_15 = arith.constant 0 : index
    %c0_16 = arith.constant 0 : index
    %11 = vector.load %arg2[%c0_14, %c0_15, %c0_16] : memref<3x64x128xbf16, #tpu.memory_space<vmem>>, vector<1x64x128xbf16>
    %12 = vector.shape_cast %11 : vector<1x64x128xbf16> to vector<64x128xbf16>
    %cst_17 = arith.constant dense<0.000000e+00> : vector<16x128xf32>
    %13 = tpu.matmul %10, %12, %cst_17 {dimension_numbers = #tpu.dot_dimension_numbers<[1], [0], [0], [1], [0, 0, 1, 1], [], []>} : vector<16x64xbf16>, vector<64x128xbf16>, vector<16x128xf32> -> vector<16x128xf32>
    %14 = arith.addf %9, %13 : vector<16x128xf32>
    %c1_18 = arith.constant 1 : index
    %c0_19 = arith.constant 0 : index
    %15 = vector.load %arg7[%c1_18, %c0_19] : memref<18x64xbf16, #tpu.memory_space<vmem>>, vector<16x64xbf16>
    %c1_20 = arith.constant 1 : index
    %c0_21 = arith.constant 0 : index
    %c0_22 = arith.constant 0 : index
    %16 = vector.load %arg2[%c1_20, %c0_21, %c0_22] : memref<3x64x128xbf16, #tpu.memory_space<vmem>>, vector<1x64x128xbf16>
    %17 = vector.shape_cast %16 : vector<1x64x128xbf16> to vector<64x128xbf16>
    %cst_23 = arith.constant dense<0.000000e+00> : vector<16x128xf32>
    %18 = tpu.matmul %15, %17, %cst_23 {dimension_numbers = #tpu.dot_dimension_numbers<[1], [0], [0], [1], [0, 0, 1, 1], [], []>} : vector<16x64xbf16>, vector<64x128xbf16>, vector<16x128xf32> -> vector<16x128xf32>
    %19 = arith.addf %14, %18 : vector<16x128xf32>
    %c2 = arith.constant 2 : index
    %c0_24 = arith.constant 0 : index
    %20 = vector.load %arg7[%c2, %c0_24] : memref<18x64xbf16, #tpu.memory_space<vmem>>, vector<16x64xbf16>
    %c2_25 = arith.constant 2 : index
    %c0_26 = arith.constant 0 : index
    %c0_27 = arith.constant 0 : index
    %21 = vector.load %arg2[%c2_25, %c0_26, %c0_27] : memref<3x64x128xbf16, #tpu.memory_space<vmem>>, vector<1x64x128xbf16>
    %22 = vector.shape_cast %21 : vector<1x64x128xbf16> to vector<64x128xbf16>
    %cst_28 = arith.constant dense<0.000000e+00> : vector<16x128xf32>
    %23 = tpu.matmul %20, %22, %cst_28 {dimension_numbers = #tpu.dot_dimension_numbers<[1], [0], [0], [1], [0, 0, 1, 1], [], []>} : vector<16x64xbf16>, vector<64x128xbf16>, vector<16x128xf32> -> vector<16x128xf32>
    %24 = arith.addf %19, %23 : vector<16x128xf32>
    %c0_29 = arith.constant 0 : index
    %c0_30 = arith.constant 0 : index
    %25 = vector.load %arg3[%c0_29, %c0_30] : memref<2x128xf32, #tpu.memory_space<vmem>>, vector<2x128xf32>
    %26 = vector.extract_strided_slice %25 {offsets = [0, 0], sizes = [1, 128], strides = [1, 1]} : vector<2x128xf32> to vector<1x128xf32>
    %27 = vector.broadcast %26 : vector<1x128xf32> to vector<16x128xf32>
    %28 = arith.mulf %24, %27 : vector<16x128xf32>
    %29 = vector.extract_strided_slice %25 {offsets = [1, 0], sizes = [1, 128], strides = [1, 1]} : vector<2x128xf32> to vector<1x128xf32>
    %30 = vector.broadcast %29 : vector<1x128xf32> to vector<16x128xf32>
    %31 = arith.addf %28, %30 : vector<16x128xf32>
    %cst_31 = arith.constant 0.000000e+00 : f32
    %32 = vector.broadcast %cst_31 : f32 to vector<16x128xf32>
    %33 = arith.maximumf %31, %32 : vector<16x128xf32>
    %34 = arith.truncf %33 : vector<16x128xf32> to vector<16x128xbf16>
    %c1_32 = arith.constant 1 : index
    %c0_33 = arith.constant 0 : index
    %35 = vector.load %arg8[%c1_32, %c0_33] : memref<18x128xbf16, #tpu.memory_space<vmem>>, vector<16x128xbf16>
    tpu.vector_store %arg8[%c1_32, %c0_33], %34 {strides = array<i32>} : memref<18x128xbf16, #tpu.memory_space<vmem>>, vector<16x128xbf16>,
    %cst_34 = arith.constant 0.000000e+00 : f32
    %36 = vector.broadcast %cst_34 : f32 to vector<16x128xf32>
    %c0_35 = arith.constant 0 : index
    %c0_36 = arith.constant 0 : index
    %37 = vector.load %arg8[%c0_35, %c0_36] : memref<18x128xbf16, #tpu.memory_space<vmem>>, vector<16x128xbf16>
    %c0_37 = arith.constant 0 : index
    %c0_38 = arith.constant 0 : index
    %c0_39 = arith.constant 0 : index
    %38 = vector.load %arg4[%c0_37, %c0_38, %c0_39] : memref<3x128x128xbf16, #tpu.memory_space<vmem>>, vector<1x128x128xbf16>
    %39 = vector.shape_cast %38 : vector<1x128x128xbf16> to vector<128x128xbf16>
    %cst_40 = arith.constant dense<0.000000e+00> : vector<16x128xf32>
    %40 = tpu.matmul %37, %39, %cst_40 {dimension_numbers = #tpu.dot_dimension_numbers<[1], [0], [0], [1], [0, 0, 1, 1], [], []>} : vector<16x128xbf16>, vector<128x128xbf16>, vector<16x128xf32> -> vector<16x128xf32>
    %41 = arith.addf %36, %40 : vector<16x128xf32>
    %c1_41 = arith.constant 1 : index
    %c0_42 = arith.constant 0 : index
    %42 = vector.load %arg8[%c1_41, %c0_42] : memref<18x128xbf16, #tpu.memory_space<vmem>>, vector<16x128xbf16>
    %c1_43 = arith.constant 1 : index
    %c0_44 = arith.constant 0 : index
    %c0_45 = arith.constant 0 : index
    %43 = vector.load %arg4[%c1_43, %c0_44, %c0_45] : memref<3x128x128xbf16, #tpu.memory_space<vmem>>, vector<1x128x128xbf16>
    %44 = vector.shape_cast %43 : vector<1x128x128xbf16> to vector<128x128xbf16>
    %cst_46 = arith.constant dense<0.000000e+00> : vector<16x128xf32>
    %45 = tpu.matmul %42, %44, %cst_46 {dimension_numbers = #tpu.dot_dimension_numbers<[1], [0], [0], [1], [0, 0, 1, 1], [], []>} : vector<16x128xbf16>, vector<128x128xbf16>, vector<16x128xf32> -> vector<16x128xf32>
    %46 = arith.addf %41, %45 : vector<16x128xf32>
    %c2_47 = arith.constant 2 : index
    %c0_48 = arith.constant 0 : index
    %47 = vector.load %arg8[%c2_47, %c0_48] : memref<18x128xbf16, #tpu.memory_space<vmem>>, vector<16x128xbf16>
    %c2_49 = arith.constant 2 : index
    %c0_50 = arith.constant 0 : index
    %c0_51 = arith.constant 0 : index
    %48 = vector.load %arg4[%c2_49, %c0_50, %c0_51] : memref<3x128x128xbf16, #tpu.memory_space<vmem>>, vector<1x128x128xbf16>
    %49 = vector.shape_cast %48 : vector<1x128x128xbf16> to vector<128x128xbf16>
    %cst_52 = arith.constant dense<0.000000e+00> : vector<16x128xf32>
    %50 = tpu.matmul %47, %49, %cst_52 {dimension_numbers = #tpu.dot_dimension_numbers<[1], [0], [0], [1], [0, 0, 1, 1], [], []>} : vector<16x128xbf16>, vector<128x128xbf16>, vector<16x128xf32> -> vector<16x128xf32>
    %51 = arith.addf %46, %50 : vector<16x128xf32>
    %c0_53 = arith.constant 0 : index
    %c0_54 = arith.constant 0 : index
    %52 = vector.load %arg5[%c0_53, %c0_54] : memref<2x128xf32, #tpu.memory_space<vmem>>, vector<2x128xf32>
    %53 = vector.extract_strided_slice %52 {offsets = [0, 0], sizes = [1, 128], strides = [1, 1]} : vector<2x128xf32> to vector<1x128xf32>
    %54 = vector.broadcast %53 : vector<1x128xf32> to vector<16x128xf32>
    %55 = arith.mulf %51, %54 : vector<16x128xf32>
    %56 = vector.extract_strided_slice %52 {offsets = [1, 0], sizes = [1, 128], strides = [1, 1]} : vector<2x128xf32> to vector<1x128xf32>
    %57 = vector.broadcast %56 : vector<1x128xf32> to vector<16x128xf32>
    %58 = arith.addf %55, %57 : vector<16x128xf32>
    %cst_55 = arith.constant 0.000000e+00 : f32
    %59 = vector.broadcast %cst_55 : f32 to vector<16x128xf32>
    %60 = arith.maximumf %58, %59 : vector<16x128xf32>
    %c0_56 = arith.constant 0 : index
    %c0_57 = arith.constant 0 : index
    %c0_58 = arith.constant 0 : index
    %61 = vector.load %arg6[%c0_56, %c0_57, %c0_58] : memref<1x16x128xf32, #tpu.memory_space<vmem>>, vector<1x16x128xf32>
    %62 = vector.shape_cast %61 : vector<1x16x128xf32> to vector<16x128xf32>
    %63 = vector.shape_cast %60 : vector<16x128xf32> to vector<1x16x128xf32>
    tpu.vector_store %arg6[%c0_56, %c0_57, %c0_58], %63 {strides = array<i32>} : memref<1x16x128xf32, #tpu.memory_space<vmem>>, vector<1x16x128xf32>,
    return
  }
  func.func @transform_0(%arg0: i32) -> (i32, i32, i32) {
    %c0_i32 = arith.constant 0 : i32
    %c0_i32_0 = arith.constant 0 : i32
    %c0_i32_1 = arith.constant 0 : i32
    return %arg0, %c0_i32, %c0_i32_0 : i32, i32, i32
  }
  func.func @transform_1(%arg0: i32) -> (i32, i32, i32) {
    %c0_i32 = arith.constant 0 : i32
    %c0_i32_0 = arith.constant 0 : i32
    %c0_i32_1 = arith.constant 0 : i32
    %c0_i32_2 = arith.constant 0 : i32
    return %c0_i32, %c0_i32_0, %c0_i32_1 : i32, i32, i32
  }
  func.func @transform_2(%arg0: i32) -> (i32, i32) {
    %c0_i32 = arith.constant 0 : i32
    %c0_i32_0 = arith.constant 0 : i32
    %c0_i32_1 = arith.constant 0 : i32
    return %c0_i32, %c0_i32_0 : i32, i32
  }
  func.func @transform_3(%arg0: i32) -> (i32, i32, i32) {
    %c0_i32 = arith.constant 0 : i32
    %c0_i32_0 = arith.constant 0 : i32
    %c0_i32_1 = arith.constant 0 : i32
    %c0_i32_2 = arith.constant 0 : i32
    return %c0_i32, %c0_i32_0, %c0_i32_1 : i32, i32, i32
  }
  func.func @transform_4(%arg0: i32) -> (i32, i32) {
    %c0_i32 = arith.constant 0 : i32
    %c0_i32_0 = arith.constant 0 : i32
    %c0_i32_1 = arith.constant 0 : i32
    return %c0_i32, %c0_i32_0 : i32, i32
  }
  func.func @transform_5(%arg0: i32) -> (i32, i32, i32) {
    %c0_i32 = arith.constant 0 : i32
    %c0_i32_0 = arith.constant 0 : i32
    %c0_i32_1 = arith.constant 0 : i32
    return %arg0, %c0_i32, %c0_i32_0 : i32, i32, i32
  }
}

</mosaic_0001>

<bundles_post_ra>
// kernel: tpu_custom_call.1
= control target key start
LH: loop header
LB: loop body
LE: loop exit
PB: predicated region body
PF: predicated region fallthrough
CT: control target
= control target key end

     0   :  { %10 = vsyncpa [#allocation5], 0  ;;  %s2007_s0 = inlined_call_operand.hbm [shape: bf16[2,16,64], index: 0, kind: input, shape index: {}]   ;;  %s2008_s1 = inlined_call_operand.hbm [shape: bf16[3,64,128], index: 1, kind: input, shape index: {}]   ;;  %s2009_s2 = inlined_call_operand.vmem [shape: f32[2,128], index: 2, kind: input, shape index: {}]   ;;  %s2010_s3 = inlined_call_operand.hbm [shape: bf16[3,128,128], index: 3, kind: input, shape index: {}]   ;;  %s2011_s4 = inlined_call_operand.vmem [shape: f32[2,128], index: 4, kind: input, shape index: {}]   ;;  %s2012_s5 = inlined_call_operand.hbm [shape: f32[2,16,128], index: 5, kind: output, shape index: {}]  }
   0x1   :  { %12 = vsyncpa [#allocation5 + $0x1], 0 }
   0x2   :  { %13 = vsyncpa [#allocation8], 0 }
   0x3   :  { %14 = vsyncpa [#allocation6], 0 }
   0x4   :  { %16 = vsyncpa [#allocation6 + $0x1], 0  ;;  %s1650_s18 = smov 0   ;;  %s1652_s19 = smov 0  }
   0x5   :  { %s1654_s20 = smov 0   ;;  %s1656_s21 = smov 0  }
   0x6 LB: > { %s1671_s22 = sadd.s32 4294967295, %s1608_s21   ;;  %s1116_s23 = sadd.s32 4294967294, %s1608_s21   ;;  %s1608_s21 = sphi %s1656_s21, %s2040_s21   ;;  %s1604_s20 = sphi %s1654_s20, %s2039_s20   ;;  %s1600_s19 = sphi %s1652_s19, %s2038_s19   ;;  %s1596_s18 = sphi %s1650_s18, %s2037_s18  }
   0x7   : > { %p42_p0 = scmp.ne.s32.totalorder %s1600_s19, %s1596_s18  ;;  %p2013_p1 = scmp.eq.s32.totalorder %s1671_s22, 0 }
   0x8   : > { %p156_p3 = scmp.eq.s32.totalorder %s1116_s23, 1  ;;  %p1117_p5 = scmp.ge.s32.totalorder %s1608_s21, 1 }
   0x9   : > { %p1680_p4 = por %p2013_p1, %p42_p0  ;;  %p163_p7 = scmp.lt.s32.totalorder %s1608_s21, 3 }
   0xa   : > { %p1685_p6 = por %p156_p3, %p42_p0  ;;  %s1610_s27 = smov [#allocation7]  }
   0xb   : > { %s2016_s24 = scalar_select %p1680_p4, 1, 0 }
   0xc   : > { %s2017_s25 = scalar_select %p1685_p6, 1, 0 }
   0xd   : > { %p1690_p8 = pnand %p1117_p5, %p163_p7  ;;  %s175_s28 = sshll.u32 %s1610_s27, 4  ;;  %s1694_s28 = int_to_ptr.vmem [resolvable:$true] %s175_s28 }
   0xe   : > { %s1611_s30 = smov [#allocation9]   ;;  %s1452_s9 = scalar_lea.hbm %s2008_s1, 1536 }
   0xf   : > { %p1349_p9 = pneg %p1690_p8  ;;  %s191_s6 = sshll.u32 %s1611_s30, 4  ;;  %s1705_s6 = int_to_ptr.vmem [resolvable:$true] %s191_s6 }
  0x10   : > { %p1453_p12 = scmp.ne.s32.totalorder %s2008_s1, %s1452_s9  ;;  %p1459_p5 = scmp.lt.u32.totalorder %s1452_s9, %s2008_s1 }
  0x11   : > { %p1701_p11 = pnand %p1349_p9, %p2013_p1 }
  0x13   : > { %p1454_p13 = pneg %p1701_p11 }
  0x15   : > { %p1455_p0 = pnand %p1454_p13, %p1453_p12 }
  0x17   : > { %p1456_p3 = pneg %p1455_p0 }
  0x19   : > { %p1461_p7 = pnand %p1459_p5, %p1456_p3 }
  0x1b   : > { %1464 = shalt.err (!%p1461_p7)
}
  0x1c   : > { %s1465_s14 = scalar_lea.vmem %s1694_s28, 1536  ;;  %p1473_p2 = scmp.lt.s32.totalorder %s1694_s28, %s1694_s28 }
  0x1d   : > { %p1466_p9 = scmp.ne.s32.totalorder %s1694_s28, %s1465_s14  ;;  %p1474_p12 = scmp.lt.s32.totalorder %s1465_s14, %s1465_s14 }
  0x1f   : > { %p1468_p10 = pnand %p1466_p9, %p1454_p13  ;;  %p1475_p0 = por %p1474_p12, %p1473_p2 }
  0x21   : > { %p1469_p1 = pneg %p1468_p10 }
  0x23   : > { %p1476_p6 = pnand %p1475_p0, %p1469_p1 }
  0x25   : > { %1479 = shalt.err (!%p1476_p6)
}
  0x26   : > { %s1612_s15 = smov 64   ;;  %s1613_s16 = smov 4  }
  0x27   : > { %1352 = dma.hbm_to_vmem [thread:$0]  (!%p1701_p11), %s2008_s1, 1536, %s1694_s28, [#allocation8], %s1612_s15, %s1612_s15, %s1613_s16  }
  0x28   : > { %s1480_s7 = scalar_lea.hbm %s2010_s3, 3072 }
  0x29   : > { %p1481_p1 = scmp.ne.s32.totalorder %s2010_s3, %s1480_s7  ;;  %p1487_p10 = scmp.lt.u32.totalorder %s1480_s7, %s2010_s3 }
  0x2b   : > { %p1483_p2 = pnand %p1481_p1, %p1454_p13 }
  0x2d   : > { %p1484_p6 = pneg %p1483_p2 }
  0x2f   : > { %p1489_p3 = pnand %p1487_p10, %p1484_p6 }
  0x31   : > { %1492 = shalt.err (!%p1489_p3)
}
  0x32   : > { %s1493_s28 = scalar_lea.vmem %s1705_s6, 3072  ;;  %p1501_p12 = scmp.lt.s32.totalorder %s1705_s6, %s1705_s6 }
  0x33   : > { %p1494_p5 = scmp.ne.s32.totalorder %s1705_s6, %s1493_s28  ;;  %p1502_p0 = scmp.lt.s32.totalorder %s1493_s28, %s1493_s28 }
  0x35   : > { %p1496_p7 = pnand %p1494_p5, %p1454_p13  ;;  %p1503_p1 = por %p1502_p0, %p1501_p12 }
  0x37   : > { %p1497_p9 = pneg %p1496_p7 }
  0x39   : > { %p1504_p2 = pnand %p1503_p1, %p1497_p9 }
  0x3b   : > { %1507 = shalt.err (!%p1504_p2)
}
  0x3c   : > { %1355 = dma.hbm_to_vmem [thread:$0]  (!%p1701_p11), %s2010_s3, 3072, %s1705_s6, [#allocation8], %s1612_s15, %s1612_s15, %s1613_s16  }
  0x3d   : > { %s1766_s29 = sadd.s32 1, %s1608_s21   ;;  %s29_s14 = sadd.s32 1, %s1604_s20 }
  0x3e   : > { %s26_s17 = ssub.s32 %s1608_s21, %s1766_s29  ;;  %p36_p13 = scmp.ne.s32.totalorder %s1604_s20, %s1600_s19 }
  0x3f   : > { %p27_p6 = scmp.eq.s32.totalorder %s26_s17, 0  ;;  %p37_p10 = scmp.eq.s32.totalorder %s1608_s21, 0 }
  0x40   : > { %p2020_p3 = scmp.eq.s32.totalorder %s1671_s22, 1  ;;  %p1366_p7 = scmp.lt.s32.totalorder %s1608_s21, 2 }
  0x41   : > { %s1782_s27 = scalar_select %p27_p6, %s1604_s20, %s29_s14  }
  0x42   : > { %p1776_p5 = por %p2020_p3, %p36_p13  ;;  %p38_p9 = por %p37_p10, %p36_p13 }
  0x43   : > { %s208_s30 = sand.u32 1, %s1604_s20   ;;  %s1181_s6 = sshll.u32 %s1608_s21, 7 }
  0x44   : > { %s2021_s23 = scalar_select %p1776_p5, 1, 0 }
  0x45   : > { %s1121_s7 = sshll.u32 %s208_s30, 3  ;;  %s1789_s10 = scalar_lea.hbm %s2007_s0, %s1181_s6 }
  0x46   : > { %s212_s11 = scalar_lea.vmem [#allocation4], %s1121_s7  ;;  %p1793_p11 = pnand %p1366_p7, %p38_p9 }
  0x47   : > { %s219_s28 = sshll.u32 %s212_s11, 4  ;;  %s1797_s13 = scalar_lea.sflag [#allocation5], %s208_s30  ;;  %s1791_s28 = int_to_ptr.vmem [resolvable:$true] %s219_s28 }
  0x48   : > { %s1508_s14 = scalar_lea.hbm %s1789_s10, 128  ;;  %p1510_p0 = pneg %p1793_p11 }
  0x49   : > { %p1509_p12 = scmp.ne.s32.totalorder %s1789_s10, %s1508_s14  ;;  %s1513_s6 = scalar_lea.hbm %s2007_s0, 256 }
  0x4a   : > { %p1514_p13 = scmp.lt.u32.totalorder %s1789_s10, %s2007_s0  ;;  %p1515_p6 = scmp.lt.u32.totalorder %s1513_s6, %s1508_s14 }
  0x4b   : > { %p1511_p1 = pnand %p1510_p0, %p1509_p12  ;;  %p1517_p3 = scmp.lt.u32.totalorder %s1508_s14, %s1789_s10 }
  0x4c   : > { %p1516_p10 = por %p1515_p6, %p1514_p13 }
  0x4d   : > { %p1512_p2 = pneg %p1511_p1 }
  0x4e   : > { %p1518_p7 = por %p1517_p3, %p1516_p10 }
  0x50   : > { %p1519_p9 = pnand %p1518_p7, %p1512_p2 }
  0x52   : > { %1522 = shalt.err (!%p1519_p9)
}
  0x53   : > { %s1523_s30 = scalar_lea.vmem %s1791_s28, 128  ;;  %s1614_s11 = smov [#allocation4]  }
  0x54   : > { %p1524_p12 = scmp.ne.s32.totalorder %s1791_s28, %s1523_s30  ;;  %s1528_s17 = sshll.u32 %s1614_s11, 4  ;;  %s1529_s17 = int_to_ptr.vmem [resolvable:$false] %s1528_s17 }
  0x55   : > { %s1530_s7 = scalar_lea.vmem %s1529_s17, 256  ;;  %p1531_p4 = scmp.lt.s32.totalorder %s1791_s28, %s1529_s17 }
  0x56   : > { %p1526_p1 = pnand %p1524_p12, %p1510_p0  ;;  %p1532_p13 = scmp.lt.s32.totalorder %s1530_s7, %s1523_s30 }
  0x58   : > { %p1527_p5 = pneg %p1526_p1  ;;  %p1533_p6 = por %p1532_p13, %p1531_p4 }
  0x5a   : > { %p1534_p10 = pnand %p1533_p6, %p1527_p5 }
  0x5c   : > { %1537 = shalt.err (!%p1534_p10)
}
  0x5d   : > { %1359 = dma.hbm_to_vmem [thread:$0]  (!%p1793_p11), %s1789_s10, 128, %s1791_s28, %s1797_s13, %s1612_s15, %s1612_s15, %s1613_s16  }
  0x5e   : > { %231 = sbr.rel (%p1690_p8) target bundleno = 675 (0x2a3), region = 40  ;;  %s1831_s14 = sand.u32 (!%p1690_p8), 1, %s1600_s19  }
  0x5f   : > { %s1125_s6 = sshll.u32 (!%p1690_p8), %s1831_s14, 3  ;;  %s234_s8 = scalar_lea.sflag (!%p1690_p8), [#allocation5], %s1831_s14 }
  0x60   : > { %s237_s9 = scalar_lea.vmem (!%p1690_p8), [#allocation4], %s1125_s6  ;;  %p2023_p4 = scmp.ne.s32.totalorder (!%p1690_p8), %s2016_s24, 0 }
  0x65   : > { %1583 = dma.done.wait (%p2023_p4), %s234_s8, 128  }
  0x66   : > { %1585 = vsyncadd (%p2023_p4), %s234_s8, 4294967168  ;;  %p2024_p5 = scmp.eq.s32.totalorder %s1671_s22, 0 }
  0x68   : > { %1587 = dma.done.wait (%p2024_p5), [#allocation8], 4608   ;;  %p2025_p11 = pmov %p2024_p5 }
  0x69   : > { %v1615_v0 = vmov 0.0   ;;  %vm1616_vm0 = vmmov 0   ;;  %vm273_vm1 = vcmask 516096   ;;  %vm274_vm2 = vsmask.f32 256  ;;  %v1410_v2 = vld [vmem:[#allocation7 + $0x20] sm:$0xff]  }
  0x6a   : > { %1589 = vsyncadd (%p2025_p11), [#allocation8], 4294962688  ;;  %1227 = vmatprep.subr.bf16.mxu0 %v1615_v0  ;;  %1235 = vmatprep.mubr.msk.bf16.mxu0 %vm1616_vm0, %v1615_v0  ;;  %vm279_vm3 = vsmask.f32 7938  ;;  %v1411_v4 = vld [vmem:[#allocation7 + $0x28] sm:$0xff]   ;;  %v1412_v5 = vld [vmem:[#allocation7 + $0x30] sm:$0xff]  }
  0x6b   : > { %1283 = vmatprep.subr.bf16.mxu1 %v1615_v0  ;;  %1299 = vmatprep.mubr.msk.bf16.mxu1 %vm1616_vm0, %v1615_v0  ;;  %vm1850_vm4 = vmand %vm273_vm1, %vm274_vm2  ;;  %vm295_vm6 = vsmask.f32 4368  ;;  %v276_v6 = vld [vmem:[#allocation2] sm:$0x1]  ;;  %v281_v7 = vld [vmem:[#allocation2 + $0x8] sm:$0x1] }
  0x6c   : > { %vm1855_vm5 = vmand %vm273_vm1, %vm279_vm3  ;;  %1228 = vmatpush3.bf16.msra.mxu0 %v1410_v2  ;;  %v293_v8 = vld [vmem:[%s237_s9] sm:$0xf]  ;;  %v277_v9 = vsel %vm1850_vm4, 0, %v276_v6  ;;  %v294_v11 = vld [vmem:[%s237_s9 + $0x4] sm:$0xf]  ;;  %vm317_vm7 = vcmask 519168  }
  0x6d   : > { %1229 = vmatprep.subr.bf16.mxu0 %v1615_v0  ;;  %v282_v10 = vsel %vm1855_vm5, 0, %v281_v7  ;;  %v298_v12 = vshrl.u32 %v293_v8, 16  ;;  %v301_v13 = vshll.u32 %v293_v8, 16  ;;  %278 = vst [vmem:[#allocation2] sm:$0x1] %v277_v9  ;;  %v306_v14 = vshrl.u32 %v294_v11, 16  ;;  %vm1867_vm8 = vmor %vm274_vm2, %vm295_vm6 }
  0x6e   : > { %283 = vst [vmem:[#allocation2 + $0x8] sm:$0x1] %v282_v10  ;;  %v309_v15 = vshll.u32 %v294_v11, 16  ;;  %v1413_v20 = vld [vmem:[#allocation7 + $0x38] sm:$0xff]   ;;  %vm318_vm9 = vmand %vm317_vm7, %vm279_vm3  ;;  %vm284_vm10 = vcmask 1040384   ;;  %v1425_v30 = vld [vmem:[#allocation9] sm:$0xff]   ;;  %v592_v11 = vlaneseq }
  0x6f   : > { %v300_v16 = vrot.slane %v298_v12, 7  ;;  %v308_v17 = vrot.slane %v306_v14, 7  ;;  %vm1879_vm11 = vmand %vm284_vm10, %vm274_vm2  ;;  %v286_v31 = vld [vmem:[#allocation3] sm:$0x1]  ;;  %1284 = vmatpush3.bf16.msra.mxu1 %v1425_v30  ;;  %vm355_vm12 = vsmask.f32 7424 }
  0x70   : > { %1230 = vmatpush3.bf16.msra.mxu0 %v1411_v4  ;;  %v287_v32 = vsel %vm1879_vm11, 0, %v286_v31  ;;  %1285 = vmatprep.subr.bf16.mxu1 %v1615_v0  ;;  %vm392_vm13 = vcmask 523264   ;;  %v1416_v42 = vld [vmem:[#allocation7] sm:$0xff]   ;;  %v1417_v45 = vld [vmem:[#allocation7 + $0x8] sm:$0xff]   ;;  %v1418_v46 = vld [vmem:[#allocation7 + $0x10] sm:$0xff]   ;;  %vm517_vm14 = vcmask 1046528  }
  0x71   : > { %1231 = vmatprep.subr.bf16.mxu0 %v1615_v0  ;;  %v304_v19 = vrot.slane %v300_v16, 4  ;;  %v303_v21 = vor.u32 %v301_v13, %v300_v16  ;;  %v311_v22 = vor.u32 %v309_v15, %v308_v17  ;;  %v313_v23 = vrot.slane %v308_v17, 4  ;;  %288 = vst [vmem:[#allocation3] sm:$0x1] %v287_v32  ;;  %v1419_v47 = vld [vmem:[#allocation7 + $0x18] sm:$0xff]   ;;  %v1420_v48 = vld [vmem:[#allocation7 + $0x40] sm:$0xff]   ;;  %vm289_vm15 = vmand %vm284_vm10, %vm279_vm3 }
  0x72   : > { %v1421_v49 = vld [vmem:[#allocation7 + $0x48] sm:$0xff]   ;;  %v1422_v51 = vld [vmem:[#allocation7 + $0x50] sm:$0xff]   ;;  %v1423_v53 = vld [vmem:[#allocation7 + $0x58] sm:$0xff]   ;;  %v1922_v12 = vshrl.u32 %v592_v11, 7  ;;  %vm632_vm1 = vcmask 1043456   ;;  %s1128_s10 = sshll.u32 %s1831_s14, 4 }
  0x73   : > { %v312_v24 = vsel %vm1867_vm8, %v304_v19, %v311_v22  ;;  %v1426_v57 = vld [vmem:[#allocation9 + $0x8] sm:$0xff]   ;;  %v1427_v58 = vld [vmem:[#allocation9 + $0x40] sm:$0xff]   ;;  %v1428_v59 = vld [vmem:[#allocation9 + $0x10] sm:$0xff]   ;;  %s271_s28 = scalar_lea.vmem [#allocation10], %s1128_s10  ;;  %s1184_s13 = sshll.u32 %s1671_s22, 8 }
  0x74   : > { %1232 = vmatpush3.bf16.msra.mxu0 %v1412_v5  ;;  %v319_v25 = vld [vmem:[#allocation2] sm:$0xf]  ;;  %323 = vst.msk [vmem:[#allocation2 + $0x4] sm:$0xf] %vm317_vm7, %v312_v24  ;;  %1286 = vmatpush3.bf16.msra.mxu1 %v1426_v57  ;;  %v1429_v60 = vld [vmem:[#allocation9 + $0x48] sm:$0xff]   ;;  %v1431_v1 = vld [vmem:[#allocation9 + $0x50] sm:$0xff]   ;;  %s1963_s17 = scalar_lea.hbm %s2012_s5, %s1184_s13 }
  0x75   : > { %1233 = vmatprep.subr.bf16.mxu0 %v1615_v0  ;;  %v324_v26 = vld [vmem:[#allocation2 + $0x8] sm:$0x1]  ;;  %v320_v27 = vsel %vm318_vm9, %v303_v21, %v319_v25  ;;  %1287 = vmatprep.subr.bf16.mxu1 %v1615_v0  ;;  %v1430_v61 = vld [vmem:[#allocation9 + $0x18] sm:$0xff]   ;;  %v290_v62 = vld [vmem:[#allocation3 + $0x8] sm:$0x1]  ;;  %v594_v13 = vsub.s32 0, %v1922_v12 }
  0x76   : > { %v325_v28 = vsel %vm1850_vm4, %v313_v23, %v324_v26  ;;  %321 = vst [vmem:[#allocation2] sm:$0xf] %v320_v27  ;;  %v291_v63 = vsel %vm289_vm15, 0, %v290_v62  ;;  %v1432_v2 = vld [vmem:[#allocation9 + $0x20] sm:$0xff]   ;;  %v1433_v3 = vld [vmem:[#allocation9 + $0x58] sm:$0xff]   ;;  %v1434_v4 = vld [vmem:[#allocation9 + $0x28] sm:$0xff]  }
  0x77   : > { %326 = vst [vmem:[#allocation2 + $0x8] sm:$0x1] %v325_v28  ;;  %292 = vst [vmem:[#allocation3 + $0x8] sm:$0x1] %v291_v63  ;;  %v1435_v5 = vld [vmem:[#allocation9 + $0x60] sm:$0xff]   ;;  %v1436_v6 = vld [vmem:[#allocation9 + $0x30] sm:$0xff]  }
  0x78   : > { %1234 = vmatpush3.bf16.msra.mxu0 %v1413_v20  ;;  %1288 = vmatpush3.bf16.msra.mxu1 %v1428_v59  ;;  %v1437_v7 = vld [vmem:[#allocation9 + $0x68] sm:$0xff]   ;;  %v1438_v8 = vld [vmem:[#allocation9 + $0x38] sm:$0xff]   ;;  %v1439_v9 = vld [vmem:[#allocation9 + $0x70] sm:$0xff]   ;;  %v600_v15 = vsub.s32 1, %v1922_v12  ;;  %s1024_s12 = sshll.u32 %s271_s28, 4  ;;  %s1011_s7 = scalar_lea.sflag [#allocation6], %s1831_s14  ;;  %s1958_s12 = int_to_ptr.vmem [resolvable:$true] %s1024_s12 }
  0x79   : > { %1239 = vmatprep.subr.bf16.mxu0 %v1615_v0  ;;  %1289 = vmatprep.subr.bf16.mxu1 %v1615_v0  ;;  %v1443_v10 = vld [vmem:[#allocation9 + $0x78] sm:$0xff]   ;;  %vm633_vm2 = vmand %vm632_vm1, %vm279_vm3  ;;  %v1446_v57 = vld [vmem:[#allocation9 + $0x90] sm:$0xff]   ;;  %s1538_s6 = scalar_lea.vmem %s1958_s12, 256  ;;  %p2034_p0 = scmp.ne.s32.totalorder %s2021_s23, 0 }
  0x7a   : > { %v591_v14 = vld [vmem:[%s2009_s2] sm:$0x3]  ;;  %v1450_v62 = vld [vmem:[#allocation9 + $0xb0] sm:$0xff]   ;;  %p1539_p8 = scmp.ne.s32.totalorder %s1958_s12, %s1538_s6  ;;  %s1617_s22 = smov [#allocation10]  }
  0x7b   : > { %v328_v33 = vld [vmem:[#allocation2 + $0x4] sm:$0xf]  ;;  %v595_v16 = vrot.slane %v591_v14, %v594_v13  ;;  %v601_v17 = vrot.slane %v591_v14, %v600_v15  ;;  %s1542_s8 = sshll.u32 %s1617_s22, 4  ;;  %s1543_s8 = int_to_ptr.vmem [resolvable:$false] %s1542_s8 }
  0x7c   : > { %1290 = vmatpush3.bf16.msra.mxu1 %v1430_v61  ;;  %v1447_v59 = vld [vmem:[#allocation9 + $0x98] sm:$0xff]   ;;  %v1449_v61 = vld [vmem:[#allocation9 + $0xa8] sm:$0xff]   ;;  %p1540_p2 = pnand %p1539_p8, %p2034_p0  ;;  %s1544_s9 = scalar_lea.vmem %s1543_s8, 512 }
  0x7d   : > { %v327_v34 = vld [vmem:[#allocation2] sm:$0xf]  ;;  %1291 = vmatprep.subr.bf16.mxu1 %v1615_v0  ;;  %p1545_p7 = scmp.lt.s32.totalorder %s1958_s12, %s1543_s8  ;;  %p1546_p9 = scmp.lt.s32.totalorder %s1544_s9, %s1538_s6 }
  0x7e   : > { %v1129_v35 = vcombine.low %v327_v34, %v328_v33  ;;  %v1415_v36 = vld [vmem:[#allocation2 + $0x8] ss:$0 sps:$4 sm:$0x11]   ;;  %v504_v50 = vld [vmem:[#allocation2] sm:$0xe]  ;;  %p1541_p3 = pneg %p1540_p2 }
  0x7f   : > { %v364_v39 = vshll.u32 %v1415_v36, 16  ;;  %v1141_v52 = vcombine.low %v504_v50, %v328_v33  ;;  %v519_v55 = vrot.slane %v1415_v36, 1  ;;  %v634_v36 = vld [vmem:[#allocation3] sm:$0xf]  ;;  %p1547_p12 = por %p1546_p9, %p1545_p7 }
  0x80   : > { %v357_v37 = vshrl.u32 %v1129_v35, 16  ;;  %v359_v38 = vshll.u32 %v1129_v35, 16  ;;  %1292 = vmatpush3.bf16.msra.mxu1 %v1432_v2  ;;  %v1451_v2 = vld [vmem:[#allocation9 + $0xb8] sm:$0xff]  }
  0x81   : > { %v366_v41 = vrot.slane %v364_v39, 1  ;;  %v518_v54 = vrot.slane %v1141_v52, 1  ;;  %1293 = vmatprep.subr.bf16.mxu1 %v1615_v0  ;;  %p1548_p1 = pnand %p1547_p12, %p1541_p3 }
  0x82   : > { %v361_v40 = vrot.slane %v359_v38, 1 }
  0x83   : > { %v520_v56 = vsel %vm517_vm14, %v518_v54, %v519_v55  ;;  %v1444_v54 = vld [vmem:[#allocation9 + $0x88] sm:$0xff]  }
  0x84   : > { %v362_v43 = vor.u32 %v361_v40, %v357_v37  ;;  %1294 = vmatpush3.bf16.msra.mxu1 %v1434_v4  ;;  %v638_v40 = vld [vmem:[#allocation3 + $0x8] sm:$0x1] }
  0x85   : > { %1295 = vmatprep.subr.bf16.mxu1 %v1615_v0 }
  0x86   : > { %v367_v44 = vsel %vm355_vm12, %v362_v43, %v366_v41 }
  0x87   : > { %1236 = vmatmul.mubr.msk.bf16.vlgmr.msra.gmra.mrb[0].mxu0 %vm392_vm13, %v367_v44 }
  0x88   : > { %1240 = vmatpush3.bf16.msra.mxu0 %v1416_v42  ;;  %1247 = vmatprep.mubr.msk.bf16.mxu0 %vm1616_vm0, %v1615_v0 }
  0x89   : > { %1241 = vmatprep.subr.bf16.mxu0 %v1615_v0  ;;  %1296 = vmatpush3.bf16.msra.mxu1 %v1436_v6 }
  0x8a   : > { %1297 = vmatprep.subr.bf16.mxu1 %v1615_v0 }
  0x8c   : > { %1242 = vmatpush3.bf16.msra.mxu0 %v1417_v45 }
  0x8d   : > { %1243 = vmatprep.subr.bf16.mxu0 %v1615_v0  ;;  %1298 = vmatpush3.bf16.msra.mxu1 %v1438_v8 }
  0x8e   : > { %1303 = vmatprep.subr.bf16.mxu1 %v1615_v0 }
  0x90   : > { %1244 = vmatpush3.bf16.msra.mxu0 %v1418_v46 }
  0x91   : > { %1245 = vmatprep.subr.bf16.mxu0 %v1615_v0 }
  0x94   : > { %1246 = vmatpush3.bf16.msra.mxu0 %v1419_v47  ;;  %v1442_v47 = vld [vmem:[#allocation9 + $0x80] sm:$0xff]  }
  0x95   : > { %1251 = vmatprep.subr.bf16.mxu0 %v1615_v0 }
  0x97   : > { %1248 = vmatmul.mubr.msk.bf16.vlgmr.msra.gmra.mrb[0].mxu0 %vm392_vm13, %v1129_v35 }
  0x98   : > { %1252 = vmatpush3.bf16.msra.mxu0 %v1420_v48  ;;  %1259 = vmatprep.mubr.msk.bf16.mxu0 %vm1616_vm0, %v1615_v0 }
  0x99   : > { %1253 = vmatprep.subr.bf16.mxu0 %v1615_v0 }
  0x9c   : > { %1254 = vmatpush3.bf16.msra.mxu0 %v1421_v49 }
  0x9d   : > { %1255 = vmatprep.subr.bf16.mxu0 %v1615_v0 }
  0xa0   : > { %1256 = vmatpush3.bf16.msra.mxu0 %v1422_v51 }
  0xa1   : > { %1257 = vmatprep.subr.bf16.mxu0 %v1615_v0 }
  0xa4   : > { %1258 = vmatpush3.bf16.msra.mxu0 %v1423_v53 }
  0xa5   : > { %1263 = vmatprep.subr.bf16.mxu0 %v1615_v0 }
  0xa7   : > { %1260 = vmatmul.mubr.msk.bf16.vlgmr.msra.gmra.mrb[0].mxu0 %vm392_vm13, %v520_v56 }
  0xa8   : > { %1279 = vmatprep.mubr.msk.bf16.mxu0 %vm1616_vm0, %v1615_v0  ;;  %1264 = vmatpush3.bf16.msra.mxu0 %v1427_v58 }
  0xa9   : > { %1265 = vmatprep.subr.bf16.mxu0 %v1615_v0 }
  0xac   : > { %1266 = vmatpush3.bf16.msra.mxu0 %v1429_v60  ;;  %v1448_v60 = vld [vmem:[#allocation9 + $0xa0] sm:$0xff]  }
  0xad   : > { %1267 = vmatprep.subr.bf16.mxu0 %v1615_v0 }
  0xb0   : > { %1268 = vmatpush3.bf16.msra.mxu0 %v1431_v1 }
  0xb1   : > { %1269 = vmatprep.subr.bf16.mxu0 %v1615_v0 }
  0xb4   : > { %1270 = vmatpush3.bf16.msra.mxu0 %v1433_v3 }
  0xb5   : > { %1271 = vmatprep.subr.bf16.mxu0 %v1615_v0 }
  0xb8   : > { %1272 = vmatpush3.bf16.msra.mxu0 %v1435_v5 }
  0xb9   : > { %1273 = vmatprep.subr.bf16.mxu0 %v1615_v0 }
  0xbc   : > { %1274 = vmatpush3.bf16.msra.mxu0 %v1437_v7 }
  0xbd   : > { %1275 = vmatprep.subr.bf16.mxu0 %v1615_v0 }
  0xc0   : > { %1276 = vmatpush3.bf16.msra.mxu0 %v1439_v9 }
  0xc1   : > { %1277 = vmatprep.subr.bf16.mxu0 %v1615_v0 }
  0xc4   : > { %1278 = vmatpush3.bf16.msra.mxu0 %v1443_v10  ;;  %v993_v10 = vld [vmem:[%s2011_s4] sm:$0x3] }
  0xc5   : > { %v997_v11 = vrot.slane %v993_v10, %v594_v13 }
 0x17a   : > { %v582_v19 = vpop.f32.mrb[0].mxu0 }
 0x17b   : > { %v596_v20 = vmul.f32 %v595_v16, %v582_v19  ;;  %v1261_v21 = vpop.f32.mrb[1].mxu0 }
 0x17c   : > { %v585_v22 = vpop.f32.mrb[2].mxu0 }
 0x17d   : > { %v602_v23 = vadd.f32 %v601_v17, %v596_v20  ;;  %v597_v24 = vmul.f32 %v595_v16, %v585_v22  ;;  %v1262_v25 = vpop.f32.mrb[3].mxu0  ;;  %v1003_v16 = vrot.slane %v993_v10, %v600_v15 }
 0x17f   : > { %v604_v26 = vmax.f32 %v602_v23, 0.0  ;;  %v603_v27 = vadd.f32 %v601_v17, %v597_v24 }
 0x181   : > { %v1182_v28 = vpack.c.bf16 %v604_v26, %v604_v26  ;;  %v605_v30 = vmax.f32 %v603_v27, 0.0 }
 0x183   : > { %v613_v31 = vshrl.u32 %v1182_v28, 16  ;;  %v1183_v32 = vpack.c.bf16 %v605_v30, %v605_v30  ;;  %v616_v34 = vshll.u32 %v1182_v28, 16 }
 0x185   : > { %v615_v33 = vrot.slane %v613_v31, 7  ;;  %v621_v35 = vshrl.u32 %v1183_v32, 16  ;;  %v624_v39 = vshll.u32 %v1183_v32, 16 }
 0x187   : > { %v618_v37 = vor.u32 %v616_v34, %v615_v33  ;;  %v623_v38 = vrot.slane %v621_v35, 7  ;;  %v619_v41 = vrot.slane %v615_v33, 4 }
 0x189   : > { %v635_v42 = vsel %vm633_vm2, %v618_v37, %v634_v36  ;;  %v626_v43 = vor.u32 %v624_v39, %v623_v38  ;;  %v628_v44 = vrot.slane %v623_v38, 4 }
 0x18a   : > { %636 = vst [vmem:[#allocation3] sm:$0xf] %v635_v42 }
 0x18b   : > { %v627_v45 = vsel %vm1867_vm8, %v619_v41, %v626_v43  ;;  %v639_v46 = vsel %vm1879_vm11, %v628_v44, %v638_v40 }
 0x18c   : > { %637 = vst [vmem:[#allocation3 + $0x4] sm:$0xf] %v627_v45  ;;  %640 = vst [vmem:[#allocation3 + $0x8] sm:$0x1] %v639_v46 }
 0x191   : > { %v641_v48 = vld [vmem:[#allocation3] sm:$0xf] }
 0x192   : > { %v877_v63 = vld [vmem:[#allocation3] sm:$0xe] }
 0x193   : > { %v642_v49 = vld [vmem:[#allocation3 + $0x4] sm:$0xf]  ;;  %v1445_v51 = vld [vmem:[#allocation3 + $0x8] ss:$0 sps:$4 sm:$0x11]  }
 0x194   : > { %v1149_v50 = vcombine.low %v641_v48, %v642_v49  ;;  %v693_v53 = vshll.u32 %v1445_v51, 16  ;;  %v1167_v1 = vcombine.low %v877_v63, %v642_v49  ;;  %v899_v4 = vrot.slane %v1445_v51, 1 }
 0x196   : > { %v688_v52 = vshll.u32 %v1149_v50, 16  ;;  %1300 = vmatmul.mubr.bf16.vlgmr.msra.gmra.mrb[0].mxu1 %v1149_v50  ;;  %v686_v18 = vshrl.u32 %v1149_v50, 16  ;;  %v695_v56 = vrot.slane %v693_v53, 1  ;;  %v898_v3 = vrot.slane %v1167_v1, 1 }
 0x197   : > { %1304 = vmatpush3.bf16.msra.mxu1 %v1442_v47  ;;  %1319 = vmatprep.mubr.msk.bf16.mxu1 %vm1616_vm0, %v1615_v0 }
 0x198   : > { %v690_v55 = vrot.slane %v688_v52, 1  ;;  %1305 = vmatprep.subr.bf16.mxu1 %v1615_v0  ;;  %v900_v5 = vsel %vm517_vm14, %v898_v3, %v899_v4 }
 0x19a   : > { %v691_v29 = vor.u32 %v690_v55, %v686_v18 }
 0x19b   : > { %1306 = vmatpush3.bf16.msra.mxu1 %v1444_v54 }
 0x19c   : > { %v696_v58 = vsel %vm355_vm12, %v691_v29, %v695_v56  ;;  %1307 = vmatprep.subr.bf16.mxu1 %v1615_v0 }
 0x19d   : > { %1280 = vmatmul.mubr.bf16.vlgmr.msra.gmra.mrb[4].mxu0 %v696_v58 }
 0x19f   : > { %1308 = vmatpush3.bf16.msra.mxu1 %v1446_v57 }
 0x1a0   : > { %1309 = vmatprep.subr.bf16.mxu1 %v1615_v0 }
 0x1a3   : > { %1310 = vmatpush3.bf16.msra.mxu1 %v1447_v59 }
 0x1a4   : > { %1311 = vmatprep.subr.bf16.mxu1 %v1615_v0 }
 0x1a7   : > { %1312 = vmatpush3.bf16.msra.mxu1 %v1448_v60 }
 0x1a8   : > { %1313 = vmatprep.subr.bf16.mxu1 %v1615_v0 }
 0x1ab   : > { %1314 = vmatpush3.bf16.msra.mxu1 %v1449_v61 }
 0x1ac   : > { %1315 = vmatprep.subr.bf16.mxu1 %v1615_v0 }
 0x1af   : > { %1316 = vmatpush3.bf16.msra.mxu1 %v1450_v62 }
 0x1b0   : > { %1317 = vmatprep.subr.bf16.mxu1 %v1615_v0 }
 0x1b3   : > { %1318 = vmatpush3.bf16.msra.mxu1 %v1451_v2 }
 0x1b6   : > { %1320 = vmatmul.mubr.bf16.vlgmr.msra.gmra.mrb[0].mxu1 %v900_v5 }
 0x270   : > { %v780_v6 = vpop.f32.mrb[4].mxu0 }
 0x271   : > { %v1281_v7 = vpop.f32.mrb[5].mxu0 }
 0x272   : > { %v783_v8 = vpop.f32.mrb[6].mxu0 }
 0x273   : > { %v1282_v9 = vpop.f32.mrb[7].mxu0 }
 0x289   : > { %v984_v0 = vpop.f32.mrb[0].mxu1 }
 0x28a   : > { %v1323_v14 = vadd.f32 %v984_v0, %v780_v6  ;;  %v1321_v17 = vpop.f32.mrb[1].mxu1 }
 0x28b   : > { %v987_v19 = vpop.f32.mrb[2].mxu1 }
 0x28c   : > { %v998_v20 = vmul.f32 %v1323_v14, %v997_v11  ;;  %v1324_v21 = vadd.f32 %v987_v19, %v783_v8  ;;  %v1322_v22 = vpop.f32.mrb[3].mxu1 }
 0x28e   : > { %v1004_v23 = vadd.f32 %v1003_v16, %v998_v20  ;;  %v999_v24 = vmul.f32 %v1324_v21, %v997_v11 }
 0x290   : > { %v1006_v25 = vmax.f32 %v1004_v23, 0.0  ;;  %v1005_v12 = vadd.f32 %v1003_v16, %v999_v24 }
 0x292   : > { %1008 = vst [vmem:[%s271_s28] sm:$0xff] %v1006_v25  ;;  %v1007_v13 = vmax.f32 %v1005_v12, 0.0 }
 0x294   : > { %1009 = vst [vmem:[%s271_s28 + $0x8] sm:$0xff] %v1007_v13 }
 0x295   : > { %1551 = shalt.err (!%p1548_p1)
}
 0x296   : > { %s1552_s24 = scalar_lea.hbm %s1963_s17, 256  ;;  %s1556_s16 = scalar_lea.hbm %s2012_s5, 512 }
 0x297   : > { %p1553_p13 = scmp.ne.s32.totalorder %s1963_s17, %s1552_s24  ;;  %p1557_p4 = scmp.lt.u32.totalorder %s1963_s17, %s2012_s5 }
 0x298   : > { %p1558_p5 = scmp.lt.u32.totalorder %s1556_s16, %s1552_s24  ;;  %p1560_p8 = scmp.lt.u32.totalorder %s1552_s24, %s1963_s17 }
 0x299   : > { %p1554_p6 = pnand %p1553_p13, %p2034_p0 }
 0x29a   : > { %p1559_p11 = por %p1558_p5, %p1557_p4 }
 0x29b   : > { %p1555_p10 = pneg %p1554_p6 }
 0x29c   : > { %p1561_p2 = por %p1560_p8, %p1559_p11 }
 0x29e   : > { %p1562_p3 = pnand %p1561_p2, %p1555_p10 }
 0x2a0   : > { %1565 = shalt.err (!%p1562_p3)
}
 0x2a1   : > { %s1618_s13 = smov 128   ;;  %s1619_s30 = smov 8  }
 0x2a2   : > { %1347 = dma.vmem_to_hbm [thread:$0]  (%p2034_p0), %s1958_s12, 256, %s1963_s17, %s1011_s7, %s1618_s13, %s1618_s13, %s1619_s30  }
 0x2a3 PF: > { %s1039_s11 = sand.u32 1, %s1596_s18   ;;  %p2035_p7 = scmp.ne.s32.totalorder %s2017_s25, 0 }
 0x2a4   : > { %p2036_p9 = scmp.ge.s32.totalorder %s1608_s21, 2  ;;  %s1040_s6 = scalar_lea.sflag [#allocation6], %s1039_s11 }
 0x2a6   : > { %p1361_p12 = pnand %p2036_p9, %p2035_p7 }
 0x2a8   : > { %1591 = dma.done.wait (!%p1361_p12), %s1040_s6, 256  }
 0x2a9   : > { %1593 = vsyncadd (!%p1361_p12), %s1040_s6, 4294967040  ;;  %p19_p1 = scmp.ge.s32.totalorder %s1766_s29, 4   ;;  %s2037_s18 = smov %s1600_s19 }
 0x2aa   : > { %s2038_s19 = smov %s1604_s20  ;;  %s2039_s20 = smov %s1782_s27 }
 0x2ab   : > { %s2040_s21 = smov %s1766_s29  ;;  %21 = sbr.rel (!%p19_p1) target bundleno = 6 (0x6), region = 97 }
 0x2b2   :  { %1045 = vsyncpa [#allocation5], 1 }
 0x2b3   :  { %1047 = vsyncpa [#allocation5 + $0x1], 1 }
 0x2b4   :  { %1048 = vsyncpa [#allocation8], 1 }
 0x2b5   :  { %1049 = vsyncpa [#allocation6], 1 }
 0x2b6   :  { %1051 = vsyncpa [#allocation6 + $0x1], 1 }

</bundles_post_ra>
